<compile_context>
chip_gen: v6e
topology: v6e:2x2x1
jax: 0.10.0
libtpu: 0.0.40
codegen_flags: <defaults>
</compile_context>

<pallas_src>
import jax
import jax.numpy as jnp
import numpy as np
from jax.experimental import pallas as pl
from jax.experimental.pallas import tpu as pltpu


def _row_mse_kernel(pred_ref, gt_ref, out_ref):
    # pred_ref / gt_ref: (R, HW) in native dtype; out_ref: (1, 1, R) f32.
    diff = pred_ref[...].astype(jnp.float32) - gt_ref[...].astype(jnp.float32)
    row_mse = jnp.mean(diff * diff, axis=-1)          # (R,) lane (XLU) reduce
    out_ref[...] = (0.5 * row_mse)[None, None, :]     # lane-dense store


def _vmem_limit_bytes():
    phys = 64 << 20                                   # conservative fallback (v7x)
    try:
        info = pltpu.get_tpu_info()
        phys = int(getattr(info, "vmem_capacity_bytes", phys) or phys)
    except Exception:
        pass
    # Headroom below physical: ~96 MiB on 128 MiB parts (v5e/v6e),
    # ~48 MiB on 64 MiB-per-core parts (v7x).
    return int(min(phys * 3 // 4, 96 << 20))


def _pick_row_tile(rows, hw, itemsize, vmem_limit_bytes):
    """Rows per block for a pair of (rows, hw) inputs."""
    sub = {4: 8, 2: 16, 1: 32}.get(itemsize, 8)       # sublane packing
    # Per-element VMEM: 2 inputs x 2 pipeline buffers (native dtype) plus
    # ~3 live f32 intermediates (casts / diff / square) inside the kernel.
    bytes_per_elem = 4 * itemsize + 3 * 4
    usable = max(vmem_limit_bytes - (4 << 20), bytes_per_elem * hw)
    target = max(1, usable // (bytes_per_elem * hw))  # rows per block by bytes
    # Keep at least 2 grid blocks so both TensorCores get work on v7x;
    # costs one extra ~0.35us grid step on single-TC chips.
    if rows >= 2 * sub:
        target = min(target, max(sub, rows // 2))
    if target >= rows:
        return rows                                   # single full-array block
    cap = max(sub, (target // sub) * sub)
    for cand in range(cap, sub - 1, -sub):            # largest aligned exact divisor
        if rows % cand == 0:
            return cand
    if cap >= 128:                                    # ragged fallback: lane-dense tile
        cap = (cap // 128) * 128
    return cap


def joints_ohkm_mse_loss(output, target, target_weight, *,
                         topk=8, use_target_weight=True):
    """output/target: (B, J, H, W); target_weight: (B, J, 1). Returns scalar."""
    B, J, H, W = output.shape
    hw = H * W
    if topk > J:
        raise ValueError(f"topk={topk} exceeds number of joints J={J}")

    rows = B * J
    # Free contiguous reshapes; keep native dtype (cast happens in-kernel).
    pred = output.reshape(rows, hw)
    gt = target.reshape(rows, hw)

    vmem_limit = _vmem_limit_bytes()
    tile = _pick_row_tile(rows, hw, pred.dtype.itemsize, vmem_limit)
    num_blocks = pl.cdiv(rows, tile)

    per_row = pl.pallas_call(
        _row_mse_kernel,
        out_shape=jax.ShapeDtypeStruct((num_blocks, 1, tile), jnp.float32),
        grid=(num_blocks,),
        in_specs=[
            pl.BlockSpec((tile, hw), lambda i: (i, 0)),
            pl.BlockSpec((tile, hw), lambda i: (i, 0)),
        ],
        out_specs=pl.BlockSpec((1, 1, tile), lambda i: (i, 0, 0)),
        compiler_params=pltpu.CompilerParams(
            dimension_semantics=("parallel",),        # independent row blocks
            vmem_limit_bytes=vmem_limit,
        ),
    )(pred, gt)

    # Drop any ragged-tail rows before they can reach the loss.
    per_joint = per_row.reshape(num_blocks * tile)[:rows].reshape(B, J)

    if use_target_weight:
        w = target_weight.reshape(B, J).astype(jnp.float32)
        per_joint = per_joint * (w * w)

    # Online hard keypoint mining + batch mean on the tiny (B, J) tensor.
    topv = jax.lax.top_k(per_joint, topk)[0]          # (B, topk)
    return jnp.mean(jnp.sum(topv, axis=1) / jnp.float32(topk))


def _reference(output, target, target_weight, *, topk=8, use_target_weight=True):
    B, J, H, W = output.shape
    pred = output.reshape(B, J, -1).astype(jnp.float32)
    gt = target.reshape(B, J, -1).astype(jnp.float32)
    if use_target_weight:
        w = target_weight.reshape(B, J, 1).astype(jnp.float32)
        pred = pred * w
        gt = gt * w
    l = 0.5 * jnp.mean((pred - gt) ** 2, axis=2)      # (B, J)
    topv = jax.lax.top_k(l, topk)[0]
    return jnp.mean(jnp.sum(topv, axis=1) / topk)


if __name__ == "__main__":
    B, J, H, W = 2, 16, 16, 16
    topk = 8
    use_target_weight = True

    key = jax.random.PRNGKey(0)
    k1, k2, k3 = jax.random.split(key, 3)
    output = jax.random.normal(k1, (B, J, H, W), dtype=jnp.float32)
    target = jax.random.normal(k2, (B, J, H, W), dtype=jnp.float32)
    target_weight = jax.random.uniform(k3, (B, J, 1), dtype=jnp.float32)

    loss = joints_ohkm_mse_loss(output, target, target_weight,
                                topk=topk, use_target_weight=use_target_weight)
    loss = jax.block_until_ready(loss)

    ref = _reference(output, target, target_weight,
                     topk=topk, use_target_weight=use_target_weight)
    assert np.allclose(np.asarray(loss), np.asarray(ref),
                       rtol=1e-5, atol=1e-6), (loss, ref)

    print("KERNEL_OK")
</pallas_src>

<mosaic_0001>
module attributes {stable_mosaic.version = 11 : i64} {
  func.func @_row_mse_kernel(%arg0: i32, %arg1: memref<16x256xf32, #tpu.memory_space<vmem>>, %arg2: memref<16x256xf32, #tpu.memory_space<vmem>>, %arg3: memref<1x1x16xf32, #tpu.memory_space<vmem>>) attributes {dimension_semantics = [#tpu.dimension_semantics<parallel>], iteration_bounds = array<i64: 2>, scalar_prefetch = 0 : i64, scratch_operands = 0 : i64, tpu.core_type = #tpu.core_type<tc>, window_params = [{transform_indices = @transform_0, window_bounds = array<i64: 16, 256>}, {transform_indices = @transform_1, window_bounds = array<i64: 16, 256>}, {transform_indices = @transform_2, window_bounds = array<i64: 1, 1, 16>}]} {
    %c0 = arith.constant 0 : index
    %c0_0 = arith.constant 0 : index
    %0 = vector.load %arg1[%c0, %c0_0] : memref<16x256xf32, #tpu.memory_space<vmem>>, vector<16x256xf32>
    %c0_1 = arith.constant 0 : index
    %c0_2 = arith.constant 0 : index
    %1 = vector.load %arg2[%c0_1, %c0_2] : memref<16x256xf32, #tpu.memory_space<vmem>>, vector<16x256xf32>
    %2 = arith.subf %0, %1 : vector<16x256xf32>
    %3 = arith.mulf %2, %2 : vector<16x256xf32>
    %cst = arith.constant dense<0.000000e+00> : vector<16xf32>
    %4 = vector.multi_reduction <add>, %3, %cst [1] : vector<16x256xf32> to vector<16xf32>
    %cst_3 = arith.constant 2.560000e+02 : f32
    %5 = vector.broadcast %cst_3 : f32 to vector<16xf32>
    %6 = arith.divf %4, %5 : vector<16xf32>
    %cst_4 = arith.constant 5.000000e-01 : f32
    %7 = vector.broadcast %cst_4 : f32 to vector<16xf32>
    %8 = arith.mulf %7, %6 : vector<16xf32>
    %9 = vector.shape_cast %8 : vector<16xf32> to vector<1x1x16xf32>
    %c0_5 = arith.constant 0 : index
    %c0_6 = arith.constant 0 : index
    %c0_7 = arith.constant 0 : index
    %10 = vector.load %arg3[%c0_5, %c0_6, %c0_7] : memref<1x1x16xf32, #tpu.memory_space<vmem>>, vector<1x1x16xf32>
    tpu.vector_store %arg3[%c0_5, %c0_6, %c0_7], %9 {strides = array<i32>} : memref<1x1x16xf32, #tpu.memory_space<vmem>>, vector<1x1x16xf32>,
    return
  }
  func.func @transform_0(%arg0: i32) -> (i32, i32) {
    %c0_i32 = arith.constant 0 : i32
    %c0_i32_0 = arith.constant 0 : i32
    return %arg0, %c0_i32 : i32, i32
  }
  func.func @transform_1(%arg0: i32) -> (i32, i32) {
    %c0_i32 = arith.constant 0 : i32
    %c0_i32_0 = arith.constant 0 : i32
    return %arg0, %c0_i32 : i32, i32
  }
  func.func @transform_2(%arg0: i32) -> (i32, i32, i32) {
    %c0_i32 = arith.constant 0 : i32
    %c0_i32_0 = arith.constant 0 : i32
    %c0_i32_1 = arith.constant 0 : i32
    return %arg0, %c0_i32, %c0_i32_0 : i32, i32, i32
  }
}

</mosaic_0001>

<bundles_post_ra>
// kernel: tpu_custom_call.1
= control target key start
LH: loop header
LB: loop body
LE: loop exit
PB: predicated region body
PF: predicated region fallthrough
CT: control target
= control target key end

     0   :  { %7 = vsyncpa [#allocation3], 0  ;;  %s783_s0 = inlined_call_operand.hbm [shape: f32[32,256], index: 0, kind: input, shape index: {}]   ;;  %s784_s1 = inlined_call_operand.hbm [shape: f32[32,256], index: 1, kind: input, shape index: {}]   ;;  %s785_s2 = inlined_call_operand.hbm [shape: f32[2,1,16], index: 2, kind: output, shape index: {}]  }
   0x1   :  { %9 = vsyncpa [#allocation3 + $0x1], 0 }
   0x2   :  { %10 = vsyncpa [#allocation6], 0 }
   0x3   :  { %12 = vsyncpa [#allocation6 + $0x1], 0 }
   0x4   :  { %13 = vsyncpa [#allocation4], 0 }
   0x5   :  { %15 = vsyncpa [#allocation4 + $0x1], 0  ;;  %s572_s9 = smov 0   ;;  %s574_s10 = smov 0  }
   0x6   :  { %s576_s11 = smov 0   ;;  %s578_s12 = smov 0  }
   0x7 LB: > { %s593_s13 = sadd.s32 4294967295, %s550_s12   ;;  %s352_s14 = sadd.s32 4294967294, %s550_s12   ;;  %s550_s12 = sphi %s578_s12, %s801_s12   ;;  %s546_s11 = sphi %s576_s11, %s800_s11   ;;  %s542_s10 = sphi %s574_s10, %s799_s10   ;;  %s538_s9 = sphi %s572_s9, %s798_s9  }
   0x8   : > { %s597_s15 = sadd.s32 1, %s550_s12   ;;  %s28_s16 = sadd.s32 1, %s546_s11 }
   0x9   : > { %s25_s17 = ssub.s32 %s550_s12, %s597_s15  ;;  %p35_p0 = scmp.ne.s32.totalorder %s546_s11, %s542_s10 }
   0xa   : > { %p26_p1 = scmp.eq.s32.totalorder %s25_s17, 0  ;;  %p36_p2 = scmp.eq.s32.totalorder %s550_s12, 0 }
   0xb   : > { %p41_p3 = scmp.ne.s32.totalorder %s542_s10, %s538_s9  ;;  %p42_p4 = scmp.eq.s32.totalorder %s593_s13, 0 }
   0xc   : > { %s609_s18 = scalar_select %p26_p1, %s546_s11, %s28_s16  }
   0xd   : > { %p611_p5 = por %p36_p2, %p35_p0  ;;  %p615_p6 = por %p42_p4, %p41_p3 }
   0xe   : > { %p91_p7 = scmp.eq.s32.totalorder %s593_s13, 1  ;;  %p97_p8 = scmp.eq.s32.totalorder %s352_s14, 1 }
   0xf   : > { %s789_s20 = scalar_select %p615_p6, 1, 0 }
  0x10   : > { %p390_p10 = scmp.lt.s32.totalorder %s550_s12, 2  ;;  %p622_p11 = por %p91_p7, %p35_p0 }
  0x11   : > { %p626_p12 = por %p97_p8, %p41_p3  ;;  %s631_s23 = sand.u32 1, %s546_s11  }
  0x12   : > { %s790_s21 = scalar_select %p622_p11, 1, 0 }
  0x13   : > { %s791_s22 = scalar_select %p626_p12, 1, 0 }
  0x14   : > { %s370_s24 = sshll.u32 %s550_s12, 9  ;;  %s355_s25 = sshll.u32 %s631_s23, 5 }
  0x15   : > { %s640_s28 = scalar_lea.hbm %s783_s0, %s370_s24  ;;  %s121_s29 = scalar_lea.vmem [#allocation2], %s355_s25 }
  0x16   : > { %s129_s30 = sshll.u32 %s121_s29, 4  ;;  %p646_p13 = pnand %p390_p10, %p611_p5  ;;  %s650_s30 = int_to_ptr.vmem [resolvable:$true] %s129_s30 }
  0x17   : > { %s118_s4 = scalar_lea.sflag [#allocation3], %s631_s23  ;;  %s426_s5 = scalar_lea.hbm %s640_s28, 512 }
  0x18   : > { %p427_p0 = scmp.ne.s32.totalorder %s640_s28, %s426_s5  ;;  %p428_p1 = pneg %p646_p13 }
  0x19   : > { %s431_s8 = scalar_lea.hbm %s783_s0, 1024  ;;  %p432_p4 = scmp.lt.s32.totalorder %s640_s28, %s783_s0 }
  0x1a   : > { %p429_p2 = pnand %p428_p1, %p427_p0  ;;  %p433_p5 = scmp.lt.s32.totalorder %s431_s8, %s426_s5 }
  0x1c   : > { %p430_p3 = pneg %p429_p2  ;;  %p434_p7 = por %p433_p5, %p432_p4 }
  0x1e   : > { %p435_p8 = pnand %p434_p7, %p430_p3 }
  0x20   : > { %438 = shalt.err (!%p435_p8)
}
  0x21   : > { %s439_s17 = scalar_lea.vmem %s650_s30, 512  ;;  %s552_s19 = smov [#allocation2]  }
  0x22   : > { %p440_p10 = scmp.ne.s32.totalorder %s650_s30, %s439_s17  ;;  %s444_s26 = sshll.u32 %s552_s19, 4  ;;  %s445_s26 = int_to_ptr.vmem [resolvable:$false] %s444_s26 }
  0x23   : > { %s446_s27 = scalar_lea.vmem %s445_s26, 1024  ;;  %p447_p9 = scmp.lt.s32.totalorder %s650_s30, %s445_s26 }
  0x24   : > { %p442_p0 = pnand %p440_p10, %p428_p1  ;;  %p448_p12 = scmp.lt.s32.totalorder %s446_s27, %s439_s17 }
  0x26   : > { %p443_p2 = pneg %p442_p0  ;;  %p449_p11 = por %p448_p12, %p447_p9 }
  0x28   : > { %p450_p4 = pnand %p449_p11, %p443_p2 }
  0x2a   : > { %453 = shalt.err (!%p450_p4)
}
  0x2b   : > { %s553_s29 = smov 256   ;;  %s554_s5 = smov 16  }
  0x2c   : > { %382 = dma.hbm_to_vmem [thread:$0]  (!%p646_p13), %s640_s28, 512, %s650_s30, %s118_s4, %s553_s29, %s553_s29, %s554_s5  }
  0x2d   : > { %p363_p9 = scmp.ge.s32.totalorder %s550_s12, 1  ;;  %p159_p11 = scmp.lt.s32.totalorder %s550_s12, 3 }
  0x2e   : > { %s693_s14 = scalar_lea.hbm %s784_s1, %s370_s24  ;;  %s143_s16 = scalar_lea.vmem [#allocation5], %s355_s25 }
  0x2f   : > { %p684_p12 = pnand %p363_p9, %p159_p11  ;;  %s151_s17 = sshll.u32 %s143_s16, 4  ;;  %s697_s17 = int_to_ptr.vmem [resolvable:$true] %s151_s17 }
  0x30   : > { %s140_s28 = scalar_lea.sflag [#allocation6], %s631_s23  ;;  %s454_s30 = scalar_lea.hbm %s693_s14, 512 }
  0x31   : > { %p455_p3 = scmp.ne.s32.totalorder %s693_s14, %s454_s30  ;;  %s459_s24 = scalar_lea.hbm %s784_s1, 1024 }
  0x32   : > { %p460_p8 = scmp.lt.s32.totalorder %s693_s14, %s784_s1  ;;  %p461_p10 = scmp.lt.s32.totalorder %s459_s24, %s454_s30 }
  0x33   : > { %p457_p5 = pnand %p455_p3, %p428_p1 }
  0x34   : > { %p462_p0 = por %p461_p10, %p460_p8 }
  0x35   : > { %p458_p7 = pneg %p457_p5 }
  0x37   : > { %p463_p2 = pnand %p462_p0, %p458_p7 }
  0x39   : > { %466 = shalt.err (!%p463_p2)
}
  0x3a   : > { %s467_s23 = scalar_lea.vmem %s697_s17, 512  ;;  %s555_s25 = smov [#allocation5]  }
  0x3b   : > { %p468_p4 = scmp.ne.s32.totalorder %s697_s17, %s467_s23  ;;  %s472_s7 = sshll.u32 %s555_s25, 4  ;;  %s473_s7 = int_to_ptr.vmem [resolvable:$false] %s472_s7 }
  0x3c   : > { %s474_s8 = scalar_lea.vmem %s473_s7, 1024  ;;  %p475_p3 = scmp.lt.s32.totalorder %s697_s17, %s473_s7 }
  0x3d   : > { %p470_p9 = pnand %p468_p4, %p428_p1  ;;  %p476_p5 = scmp.lt.s32.totalorder %s474_s8, %s467_s23 }
  0x3f   : > { %p471_p11 = pneg %p470_p9  ;;  %p477_p6 = por %p476_p5, %p475_p3 }
  0x41   : > { %p478_p8 = pnand %p477_p6, %p471_p11 }
  0x43   : > { %481 = shalt.err (!%p478_p8)
}
  0x44   : > { %385 = dma.hbm_to_vmem [thread:$0]  (!%p646_p13), %s693_s14, 512, %s697_s17, %s140_s28, %s553_s29, %s553_s29, %s554_s5  }
  0x45   : > { %163 = sbr.rel (%p684_p12) target bundleno = 247 (0xf7), region = 28  ;;  %s728_s16 = sand.u32 (!%p684_p12), 1, %s542_s10  }
  0x46   : > { %s364_s30 = sshll.u32 (!%p684_p12), %s728_s16, 5  ;;  %s166_s4 = scalar_lea.sflag (!%p684_p12), [#allocation3], %s728_s16 }
  0x47   : > { %s169_s19 = scalar_lea.vmem (!%p684_p12), [#allocation2], %s364_s30  ;;  %p794_p6 = scmp.ne.s32.totalorder (!%p684_p12), %s789_s20, 0 }
  0x4a   : > { %525 = dma.done.wait (%p794_p6), %s166_s4, 512  }
  0x4b   : > { %527 = vsyncadd (%p794_p6), %s166_s4, 4294966784  ;;  %s175_s3 = scalar_lea.sflag [#allocation6], %s728_s16  ;;  %s178_s29 = scalar_lea.vmem [#allocation5], %s364_s30 }
  0x4c   : > { %529 = dma.done.wait (%p794_p6), %s175_s3, 512  }
  0x4d   : > { %531 = vsyncadd (%p794_p6), %s175_s3, 4294966784  ;;  %v205_v0 = vld [vmem:[%s169_s19] sm:$0xff]  ;;  %v206_v1 = vld [vmem:[%s169_s19 + $0x8] sm:$0xff]  ;;  %v234_v18 = vlaneseq  ;;  %s366_s20 = sshll.u32 %s593_s13, 4  ;;  %s202_s5 = scalar_lea.vmem [#allocation7], %s728_s16  ;;  %vm245_vm0 = vcmask 130112  }
  0x4e   : > { %v209_v2 = vld [vmem:[%s178_s29] sm:$0xff]  ;;  %v210_v3 = vld [vmem:[%s178_s29 + $0x8] sm:$0xff]  ;;  %v207_v5 = vld [vmem:[%s169_s19 + $0x10] sm:$0xff]  ;;  %s263_s6 = sshll.u32 %s202_s5, 4  ;;  %vm248_vm1 = vcmask 122880   ;;  %s746_s28 = scalar_lea.hbm %s785_s2, %s366_s20  ;;  %s264_s6 = int_to_ptr.vmem [resolvable:$true] %s263_s6 }
  0x4f   : > { %v213_v4 = vsub.f32 %v205_v0, %v209_v2  ;;  %v208_v6 = vld [vmem:[%s169_s19 + $0x18] sm:$0xff]  ;;  %v214_v7 = vsub.f32 %v206_v1, %v210_v3  ;;  %v211_v8 = vld [vmem:[%s178_s29 + $0x10] sm:$0xff]  ;;  %v235_v19 = vand.u32 127, %v234_v18  ;;  %v237_v21 = vshrl.u32 %v234_v18, 7  ;;  %s251_s24 = scalar_lea.sflag [#allocation4], %s728_s16  ;;  %s482_s26 = scalar_lea.vmem %s264_s6, 16 }
  0x50   : > { %v212_v9 = vld [vmem:[%s178_s29 + $0x18] sm:$0xff]  ;;  %v215_v11 = vsub.f32 %v207_v5, %v211_v8  ;;  %p483_p13 = scmp.ne.s32.totalorder %s264_s6, %s482_s26  ;;  %p795_p1 = scmp.ne.s32.totalorder %s790_s21, 0 }
  0x51   : > { %v217_v10 = vmul.f32 %v213_v4, %v213_v4  ;;  %v216_v12 = vsub.f32 %v208_v6, %v212_v9  ;;  %v218_v13 = vmul.f32 %v214_v7, %v214_v7  ;;  %v240_v23 = vadd.s32 4294967288, %v235_v19  ;;  %s556_s13 = smov [#allocation7]  }
  0x52   : > { %v219_v14 = vmul.f32 %v215_v11, %v215_v11  ;;  %v238_v25 = vsub.s32 %v235_v19, %v237_v21  ;;  %p484_p12 = pnand %p483_p13, %p795_p1  ;;  %s486_s27 = sshll.u32 %s556_s13, 4  ;;  %s487_s27 = int_to_ptr.vmem [resolvable:$false] %s486_s27 }
  0x53   : > { %v220_v15 = vmul.f32 %v216_v12, %v216_v12  ;;  %v221_v16 = vadd.f32 %v218_v13, %v217_v10  ;;  %v243_v27 = vsub.s32 %v240_v23, %v237_v21  ;;  %s488_s23 = scalar_lea.vmem %s487_s27, 32  ;;  %p489_p10 = scmp.lt.s32.totalorder %s264_s6, %s487_s27 }
  0x54   : > { %p485_p7 = pneg %p484_p12  ;;  %p490_p0 = scmp.lt.s32.totalorder %s488_s23, %s482_s26 }
  0x55   : > { %222 = vadd.xlane.f32.xlu0 %v221_v16  ;;  %v224_v17 = vadd.f32 %v220_v15, %v219_v14 }
  0x56   : > { %p491_p2 = por %p490_p0, %p489_p10 }
  0x58   : > { %p492_p4 = pnand %p491_p2, %p485_p7 }
  0x59   : > { %225 = vadd.xlane.f32.xlu0 %v224_v17 }
  0xde   : > { %v223_v20 = vpop.xlane.xlu0 %222 }
  0xdf   : > { %v228_v22 = vmul.f32 0.00390625, %v223_v20 }
  0xe1   : > { %v230_v26 = vmul.f32 0.5, %v228_v22 }
  0xe2   : > { %v226_v24 = vpop.xlane.xlu0 %225 }
  0xe3   : > { %v229_v28 = vmul.f32 0.00390625, %v226_v24  ;;  %v239_v30 = vrot.slane %v230_v26, %v238_v25 }
  0xe5   : > { %v231_v29 = vmul.f32 0.5, %v229_v28 }
  0xe7   : > { %v244_v31 = vrot.slane %v231_v29, %v243_v27 }
  0xe9   : > { %v246_v32 = vsel %vm245_vm0, %v244_v31, %v239_v30 }
  0xea   : > { %249 = vst.msk [vmem:[%s202_s5] sm:$0x1] %vm248_vm1, %v246_v32 }
  0xeb   : > { %495 = shalt.err (!%p492_p4)
}
  0xec   : > { %s496_s25 = scalar_lea.hbm %s746_s28, 16  ;;  %s500_s16 = scalar_lea.hbm %s785_s2, 32 }
  0xed   : > { %p497_p9 = scmp.ne.s32.totalorder %s746_s28, %s496_s25  ;;  %p501_p5 = scmp.lt.s32.totalorder %s746_s28, %s785_s2 }
  0xee   : > { %p502_p8 = scmp.lt.s32.totalorder %s500_s16, %s496_s25 }
  0xef   : > { %p498_p11 = pnand %p497_p9, %p795_p1 }
  0xf0   : > { %p503_p6 = por %p502_p8, %p501_p5 }
  0xf1   : > { %p499_p3 = pneg %p498_p11 }
  0xf3   : > { %p504_p13 = pnand %p503_p6, %p499_p3 }
  0xf5   : > { %507 = shalt.err (!%p504_p13)
}
  0xf6   : > { %377 = dma.vmem_to_hbm [thread:$0]  (%p795_p1), %s264_s6, 16, %s746_s28, %s251_s24  }
  0xf7 PF: > { %s275_s19 = sand.u32 1, %s538_s9   ;;  %p796_p12 = scmp.ne.s32.totalorder %s791_s22, 0 }
  0xf8   : > { %p797_p7 = scmp.ge.s32.totalorder %s550_s12, 2  ;;  %s276_s3 = scalar_lea.sflag [#allocation4], %s275_s19 }
  0xfa   : > { %p387_p10 = pnand %p797_p7, %p796_p12 }
  0xfc   : > { %p388_p0 = pneg %p387_p10 }
  0xfe   : > { %533 = dma.done.wait (%p388_p0), %s276_s3, 16  }
  0xff   : > { %535 = vsyncadd (%p388_p0), %s276_s3, 4294967280  ;;  %p18_p2 = scmp.ge.s32.totalorder %s597_s15, 4   ;;  %s798_s9 = smov %s542_s10 }
 0x100   : > { %s799_s10 = smov %s546_s11  ;;  %s800_s11 = smov %s609_s18 }
 0x101   : > { %s801_s12 = smov %s597_s15  ;;  %20 = sbr.rel (!%p18_p2) target bundleno = 7 (0x7), region = 86 }
 0x106   :  { %280 = vsyncpa [#allocation3], 1 }
 0x107   :  { %282 = vsyncpa [#allocation3 + $0x1], 1 }
 0x108   :  { %283 = vsyncpa [#allocation6], 1 }
 0x109   :  { %285 = vsyncpa [#allocation6 + $0x1], 1 }
 0x10a   :  { %286 = vsyncpa [#allocation4], 1 }
 0x10b   :  { %288 = vsyncpa [#allocation4 + $0x1], 1 }

</bundles_post_ra>
